<compile_context>
chip_gen: v7x
topology: tpu7x:2x2x1
jax: 0.10.0
libtpu: 0.0.40
codegen_flags: <defaults>
</compile_context>

<pallas_src>
import jax
import jax.numpy as jnp
from jax import lax
from jax.experimental import pallas as pl
from jax.experimental.pallas import tpu as pltpu


def conv_bn_res_kernel(x0_ref, x1_ref, x2_ref, w_ref, shift_ref, o_ref):
    # x{0,1,2}_ref: (H+2, W+2, C_in) bf16  -- depth slabs dz = 0, 1, 2
    # w_ref:        (9, 3*C_in, C_out) bf16 -- BN-scale-folded weights,
    #               tap = dy*3+dx, rows ordered (dz, c_in)
    # shift_ref:    (1, C_out) f32          -- beta - running_mean * scale
    # o_ref:        (C_out, H*W)            -- transposed (lane-dense) output
    hp2, wp2, c_in = x0_ref.shape
    H, W = hp2 - 2, wp2 - 2
    c_out = o_ref.shape[0]

    s0 = x0_ref[...]
    s1 = x1_ref[...]
    s2 = x2_ref[...]
    # Fold dz into the contraction dim: (H+2, W+2, 3*C_in).
    s_cat = jnp.concatenate([s0, s1, s2], axis=-1)

    acc = jnp.zeros((H * W, c_out), dtype=jnp.float32)
    tap = 0
    for dy in range(3):
        for dx in range(3):
            win = s_cat[dy:dy + H, dx:dx + W, :]             # (H, W, 3*C_in)
            acc = acc + jnp.dot(win.reshape(H * W, 3 * c_in), w_ref[tap],
                                preferred_element_type=jnp.float32)
            tap += 1

    # Residual = centre tap of the middle depth slab (the original x rows),
    # already resident in VMEM (bf16-rounded; tolerance widened accordingly).
    res = s1[1:1 + H, 1:1 + W, :].reshape(H * W, c_in).astype(jnp.float32)

    y = acc + shift_ref[...] + res                           # (H*W, C_out) f32
    o_ref[...] = jnp.transpose(y).astype(o_ref.dtype)        # (C_out, H*W)


def basic_res_conv3d(x, w, gamma, beta, running_mean, running_var, eps=1e-5):
    """x: (B, C, D, H, W), w: (C_out, C_in, 3, 3, 3), stride=1, padding=1.
       Returns bn(conv3d(x)) + x with shape (B, C, D, H, W)."""
    B, C_in, D, H, W = x.shape
    C_out, C_in_w, kd, kh, kw = w.shape
    assert C_in_w == C_in and C_out == C_in, "residual add needs C_out == C_in"
    assert (kd, kh, kw) == (3, 3, 3), "kernel written for 3x3x3, stride 1, pad 1"

    # --- BN constants: fold scale into the weight, keep only the shift. -----
    inv_std = (gamma / jnp.sqrt(running_var + eps)).astype(jnp.float32)
    shift = (beta - running_mean * inv_std).reshape(1, C_out).astype(jnp.float32)

    w_scaled = w.astype(jnp.float32) * inv_std[:, None, None, None, None]
    # (C_out, C_in, dz, dy, dx) -> (dy, dx, dz, C_in, C_out) -> (9, 3*C_in, C_out)
    w_taps = jnp.transpose(w_scaled, (3, 4, 2, 1, 0)).reshape(9, 3 * C_in, C_out)
    w_taps = w_taps.astype(jnp.bfloat16)

    # --- channel-last, spatially padded, bf16 (halves the dominant stream) --
    x_cl = jnp.transpose(x, (0, 2, 3, 4, 1))                 # (B, D, H, W, C)
    xp = jnp.pad(x_cl, ((0, 0), (1, 1), (1, 1), (1, 1), (0, 0)))
    xp = xp.astype(jnp.bfloat16)                             # (B, D+2, H+2, W+2, C)

    Hp, Wp = H + 2, W + 2

    def slab_spec(dz):
        # size-1 (squeezed) blocks along B and padded-D -> block index is the
        # element index, so `d + dz` selects the overlapping depth slab.
        return pl.BlockSpec((None, None, Hp, Wp, C_in),
                            lambda b, d, dz=dz: (b, d + dz, 0, 0, 0))

    slab_bytes = Hp * Wp * C_in * 2                          # bf16
    step_bytes = (3 * slab_bytes + 9 * 3 * C_in * C_out * 2
                  + C_out * 4 + H * W * C_out * 4)
    vmem_limit = int(min(64 * 1024 * 1024,
                         max(16 * 1024 * 1024, 6 * step_bytes)))

    out = pl.pallas_call(
        conv_bn_res_kernel,
        out_shape=jax.ShapeDtypeStruct((B, D, C_out, H * W), x.dtype),
        grid=(B, D),
        in_specs=[
            slab_spec(0), slab_spec(1), slab_spec(2),        # overlapping depth slabs
            pl.BlockSpec((9, 3 * C_in, C_out), lambda b, d: (0, 0, 0)),  # weights
            pl.BlockSpec((1, C_out), lambda b, d: (0, 0)),               # BN shift
        ],
        out_specs=pl.BlockSpec((None, None, C_out, H * W),
                               lambda b, d: (b, d, 0, 0)),
        compiler_params=pltpu.CompilerParams(
            dimension_semantics=("parallel", "parallel"),
            vmem_limit_bytes=vmem_limit),
        cost_estimate=pl.CostEstimate(
            flops=2 * B * D * H * W * 27 * C_in * C_out,
            transcendentals=0,
            bytes_accessed=(B * D * 3 * slab_bytes           # slab reads (bf16)
                            + 9 * 3 * C_in * C_out * 2       # folded weights
                            + C_out * 4                      # BN shift
                            + B * D * H * W * C_out * 4)),   # output (f32)
    )(xp, xp, xp, w_taps, shift)

    out = out.reshape(B, D, C_out, H, W)
    return jnp.transpose(out, (0, 2, 1, 3, 4))               # -> (B, C, D, H, W)


def basic_res_conv3d_ref(x, w, gamma, beta, running_mean, running_var, eps=1e-5):
    """Pure-JAX reference mirroring the PyTorch forward (inference-mode BN)."""
    y = lax.conv_general_dilated(
        x, w, window_strides=(1, 1, 1),
        padding=((1, 1), (1, 1), (1, 1)),
        dimension_numbers=("NCDHW", "OIDHW", "NCDHW"),
        precision=lax.Precision.HIGHEST)
    inv_std = gamma / jnp.sqrt(running_var + eps)
    y = (y * inv_std[None, :, None, None, None]
         + (beta - running_mean * inv_std)[None, :, None, None, None])
    return y + x


if __name__ == "__main__":
    # Small shapes consistent with the module (kernel_size=3, padding=1 so the
    # residual add is shape-compatible): B=2, C=8, D=4, H=W=8.
    B, C, D, H, W = 2, 8, 4, 8, 8

    key = jax.random.PRNGKey(0)
    kx, kw, kg, kb, km, kv = jax.random.split(key, 6)
    x = jax.random.normal(kx, (B, C, D, H, W), dtype=jnp.float32)
    w = jax.random.normal(kw, (C, C, 3, 3, 3), dtype=jnp.float32) * 0.05
    gamma = 1.0 + 0.1 * jax.random.normal(kg, (C,), dtype=jnp.float32)
    beta = 0.1 * jax.random.normal(kb, (C,), dtype=jnp.float32)
    running_mean = 0.1 * jax.random.normal(km, (C,), dtype=jnp.float32)
    running_var = jnp.abs(jax.random.normal(kv, (C,), dtype=jnp.float32)) + 0.5

    out = basic_res_conv3d(x, w, gamma, beta, running_mean, running_var)
    out = jax.block_until_ready(out)

    ref = basic_res_conv3d_ref(x, w, gamma, beta, running_mean, running_var)
    assert out.shape == (B, C, D, H, W), out.shape
    # Tolerance widened vs. the all-f32 version: the conv operands and the
    # in-VMEM residual are bf16 (per perf review); observed error << 2e-2.
    assert jnp.allclose(out, ref, atol=2e-2, rtol=2e-2), "mismatch vs reference"

    print("KERNEL_OK")
</pallas_src>

<mosaic_0001>
module attributes {stable_mosaic.version = 11 : i64} {
  func.func @conv_bn_res_kernel(%arg0: i32, %arg1: i32, %arg2: memref<1x1x10x10x8xbf16, #tpu.memory_space<vmem>>, %arg3: memref<1x1x10x10x8xbf16, #tpu.memory_space<vmem>>, %arg4: memref<1x1x10x10x8xbf16, #tpu.memory_space<vmem>>, %arg5: memref<9x24x8xbf16, #tpu.memory_space<vmem>>, %arg6: memref<1x8xf32, #tpu.memory_space<vmem>>, %arg7: memref<1x1x8x64xf32, #tpu.memory_space<vmem>>) attributes {dimension_semantics = [#tpu.dimension_semantics<parallel>, #tpu.dimension_semantics<parallel>], iteration_bounds = array<i64: 2, 4>, scalar_prefetch = 0 : i64, scratch_operands = 0 : i64, tpu.core_type = #tpu.core_type<tc>, window_params = [{transform_indices = @transform_0, window_bounds = array<i64: 1, 1, 10, 10, 8>}, {transform_indices = @transform_1, window_bounds = array<i64: 1, 1, 10, 10, 8>}, {transform_indices = @transform_2, window_bounds = array<i64: 1, 1, 10, 10, 8>}, {pipeline_mode = #tpu.pipeline_mode<synchronous>, transform_indices = @transform_3, window_bounds = array<i64: 9, 24, 8>}, {pipeline_mode = #tpu.pipeline_mode<synchronous>, transform_indices = @transform_4, window_bounds = array<i64: 1, 8>}, {transform_indices = @transform_5, window_bounds = array<i64: 1, 1, 8, 64>}]} {
    %c0 = arith.constant 0 : index
    %c0_0 = arith.constant 0 : index
    %c0_1 = arith.constant 0 : index
    %c0_2 = arith.constant 0 : index
    %c0_3 = arith.constant 0 : index
    %0 = vector.load %arg2[%c0, %c0_0, %c0_1, %c0_2, %c0_3] : memref<1x1x10x10x8xbf16, #tpu.memory_space<vmem>>, vector<1x1x10x10x8xbf16>
    %1 = vector.shape_cast %0 : vector<1x1x10x10x8xbf16> to vector<10x10x8xbf16>
    %c0_4 = arith.constant 0 : index
    %c0_5 = arith.constant 0 : index
    %c0_6 = arith.constant 0 : index
    %c0_7 = arith.constant 0 : index
    %c0_8 = arith.constant 0 : index
    %2 = vector.load %arg3[%c0_4, %c0_5, %c0_6, %c0_7, %c0_8] : memref<1x1x10x10x8xbf16, #tpu.memory_space<vmem>>, vector<1x1x10x10x8xbf16>
    %3 = vector.shape_cast %2 : vector<1x1x10x10x8xbf16> to vector<10x10x8xbf16>
    %c0_9 = arith.constant 0 : index
    %c0_10 = arith.constant 0 : index
    %c0_11 = arith.constant 0 : index
    %c0_12 = arith.constant 0 : index
    %c0_13 = arith.constant 0 : index
    %4 = vector.load %arg4[%c0_9, %c0_10, %c0_11, %c0_12, %c0_13] : memref<1x1x10x10x8xbf16, #tpu.memory_space<vmem>>, vector<1x1x10x10x8xbf16>
    %5 = vector.shape_cast %4 : vector<1x1x10x10x8xbf16> to vector<10x10x8xbf16>
    %6 = tpu.concatenate %1, %3, %5 in 2 : vector<10x10x8xbf16>, vector<10x10x8xbf16>, vector<10x10x8xbf16> -> vector<10x10x24xbf16>
    %cst = arith.constant 0.000000e+00 : f32
    %7 = vector.broadcast %cst : f32 to vector<64x8xf32>
    %8 = vector.extract_strided_slice %6 {offsets = [0, 0, 0], sizes = [8, 8, 24], strides = [1, 1, 1]} : vector<10x10x24xbf16> to vector<8x8x24xbf16>
    %9 = vector.shape_cast %8 : vector<8x8x24xbf16> to vector<64x24xbf16>
    %c0_14 = arith.constant 0 : index
    %c0_15 = arith.constant 0 : index
    %c0_16 = arith.constant 0 : index
    %10 = vector.load %arg5[%c0_14, %c0_15, %c0_16] : memref<9x24x8xbf16, #tpu.memory_space<vmem>>, vector<1x24x8xbf16>
    %11 = vector.shape_cast %10 : vector<1x24x8xbf16> to vector<24x8xbf16>
    %cst_17 = arith.constant dense<0.000000e+00> : vector<64x8xf32>
    %12 = tpu.matmul %9, %11, %cst_17 {dimension_numbers = #tpu.dot_dimension_numbers<[1], [0], [0], [1], [0, 0, 1, 1], [], []>} : vector<64x24xbf16>, vector<24x8xbf16>, vector<64x8xf32> -> vector<64x8xf32>
    %13 = arith.addf %7, %12 : vector<64x8xf32>
    %14 = vector.extract_strided_slice %6 {offsets = [0, 1, 0], sizes = [8, 8, 24], strides = [1, 1, 1]} : vector<10x10x24xbf16> to vector<8x8x24xbf16>
    %15 = vector.shape_cast %14 : vector<8x8x24xbf16> to vector<64x24xbf16>
    %c1 = arith.constant 1 : index
    %c0_18 = arith.constant 0 : index
    %c0_19 = arith.constant 0 : index
    %16 = vector.load %arg5[%c1, %c0_18, %c0_19] : memref<9x24x8xbf16, #tpu.memory_space<vmem>>, vector<1x24x8xbf16>
    %17 = vector.shape_cast %16 : vector<1x24x8xbf16> to vector<24x8xbf16>
    %cst_20 = arith.constant dense<0.000000e+00> : vector<64x8xf32>
    %18 = tpu.matmul %15, %17, %cst_20 {dimension_numbers = #tpu.dot_dimension_numbers<[1], [0], [0], [1], [0, 0, 1, 1], [], []>} : vector<64x24xbf16>, vector<24x8xbf16>, vector<64x8xf32> -> vector<64x8xf32>
    %19 = arith.addf %13, %18 : vector<64x8xf32>
    %20 = vector.extract_strided_slice %6 {offsets = [0, 2, 0], sizes = [8, 8, 24], strides = [1, 1, 1]} : vector<10x10x24xbf16> to vector<8x8x24xbf16>
    %21 = vector.shape_cast %20 : vector<8x8x24xbf16> to vector<64x24xbf16>
    %c2 = arith.constant 2 : index
    %c0_21 = arith.constant 0 : index
    %c0_22 = arith.constant 0 : index
    %22 = vector.load %arg5[%c2, %c0_21, %c0_22] : memref<9x24x8xbf16, #tpu.memory_space<vmem>>, vector<1x24x8xbf16>
    %23 = vector.shape_cast %22 : vector<1x24x8xbf16> to vector<24x8xbf16>
    %cst_23 = arith.constant dense<0.000000e+00> : vector<64x8xf32>
    %24 = tpu.matmul %21, %23, %cst_23 {dimension_numbers = #tpu.dot_dimension_numbers<[1], [0], [0], [1], [0, 0, 1, 1], [], []>} : vector<64x24xbf16>, vector<24x8xbf16>, vector<64x8xf32> -> vector<64x8xf32>
    %25 = arith.addf %19, %24 : vector<64x8xf32>
    %26 = vector.extract_strided_slice %6 {offsets = [1, 0, 0], sizes = [8, 8, 24], strides = [1, 1, 1]} : vector<10x10x24xbf16> to vector<8x8x24xbf16>
    %27 = vector.shape_cast %26 : vector<8x8x24xbf16> to vector<64x24xbf16>
    %c3 = arith.constant 3 : index
    %c0_24 = arith.constant 0 : index
    %c0_25 = arith.constant 0 : index
    %28 = vector.load %arg5[%c3, %c0_24, %c0_25] : memref<9x24x8xbf16, #tpu.memory_space<vmem>>, vector<1x24x8xbf16>
    %29 = vector.shape_cast %28 : vector<1x24x8xbf16> to vector<24x8xbf16>
    %cst_26 = arith.constant dense<0.000000e+00> : vector<64x8xf32>
    %30 = tpu.matmul %27, %29, %cst_26 {dimension_numbers = #tpu.dot_dimension_numbers<[1], [0], [0], [1], [0, 0, 1, 1], [], []>} : vector<64x24xbf16>, vector<24x8xbf16>, vector<64x8xf32> -> vector<64x8xf32>
    %31 = arith.addf %25, %30 : vector<64x8xf32>
    %32 = vector.extract_strided_slice %6 {offsets = [1, 1, 0], sizes = [8, 8, 24], strides = [1, 1, 1]} : vector<10x10x24xbf16> to vector<8x8x24xbf16>
    %33 = vector.shape_cast %32 : vector<8x8x24xbf16> to vector<64x24xbf16>
    %c4 = arith.constant 4 : index
    %c0_27 = arith.constant 0 : index
    %c0_28 = arith.constant 0 : index
    %34 = vector.load %arg5[%c4, %c0_27, %c0_28] : memref<9x24x8xbf16, #tpu.memory_space<vmem>>, vector<1x24x8xbf16>
    %35 = vector.shape_cast %34 : vector<1x24x8xbf16> to vector<24x8xbf16>
    %cst_29 = arith.constant dense<0.000000e+00> : vector<64x8xf32>
    %36 = tpu.matmul %33, %35, %cst_29 {dimension_numbers = #tpu.dot_dimension_numbers<[1], [0], [0], [1], [0, 0, 1, 1], [], []>} : vector<64x24xbf16>, vector<24x8xbf16>, vector<64x8xf32> -> vector<64x8xf32>
    %37 = arith.addf %31, %36 : vector<64x8xf32>
    %38 = vector.extract_strided_slice %6 {offsets = [1, 2, 0], sizes = [8, 8, 24], strides = [1, 1, 1]} : vector<10x10x24xbf16> to vector<8x8x24xbf16>
    %39 = vector.shape_cast %38 : vector<8x8x24xbf16> to vector<64x24xbf16>
    %c5 = arith.constant 5 : index
    %c0_30 = arith.constant 0 : index
    %c0_31 = arith.constant 0 : index
    %40 = vector.load %arg5[%c5, %c0_30, %c0_31] : memref<9x24x8xbf16, #tpu.memory_space<vmem>>, vector<1x24x8xbf16>
    %41 = vector.shape_cast %40 : vector<1x24x8xbf16> to vector<24x8xbf16>
    %cst_32 = arith.constant dense<0.000000e+00> : vector<64x8xf32>
    %42 = tpu.matmul %39, %41, %cst_32 {dimension_numbers = #tpu.dot_dimension_numbers<[1], [0], [0], [1], [0, 0, 1, 1], [], []>} : vector<64x24xbf16>, vector<24x8xbf16>, vector<64x8xf32> -> vector<64x8xf32>
    %43 = arith.addf %37, %42 : vector<64x8xf32>
    %44 = vector.extract_strided_slice %6 {offsets = [2, 0, 0], sizes = [8, 8, 24], strides = [1, 1, 1]} : vector<10x10x24xbf16> to vector<8x8x24xbf16>
    %45 = vector.shape_cast %44 : vector<8x8x24xbf16> to vector<64x24xbf16>
    %c6 = arith.constant 6 : index
    %c0_33 = arith.constant 0 : index
    %c0_34 = arith.constant 0 : index
    %46 = vector.load %arg5[%c6, %c0_33, %c0_34] : memref<9x24x8xbf16, #tpu.memory_space<vmem>>, vector<1x24x8xbf16>
    %47 = vector.shape_cast %46 : vector<1x24x8xbf16> to vector<24x8xbf16>
    %cst_35 = arith.constant dense<0.000000e+00> : vector<64x8xf32>
    %48 = tpu.matmul %45, %47, %cst_35 {dimension_numbers = #tpu.dot_dimension_numbers<[1], [0], [0], [1], [0, 0, 1, 1], [], []>} : vector<64x24xbf16>, vector<24x8xbf16>, vector<64x8xf32> -> vector<64x8xf32>
    %49 = arith.addf %43, %48 : vector<64x8xf32>
    %50 = vector.extract_strided_slice %6 {offsets = [2, 1, 0], sizes = [8, 8, 24], strides = [1, 1, 1]} : vector<10x10x24xbf16> to vector<8x8x24xbf16>
    %51 = vector.shape_cast %50 : vector<8x8x24xbf16> to vector<64x24xbf16>
    %c7 = arith.constant 7 : index
    %c0_36 = arith.constant 0 : index
    %c0_37 = arith.constant 0 : index
    %52 = vector.load %arg5[%c7, %c0_36, %c0_37] : memref<9x24x8xbf16, #tpu.memory_space<vmem>>, vector<1x24x8xbf16>
    %53 = vector.shape_cast %52 : vector<1x24x8xbf16> to vector<24x8xbf16>
    %cst_38 = arith.constant dense<0.000000e+00> : vector<64x8xf32>
    %54 = tpu.matmul %51, %53, %cst_38 {dimension_numbers = #tpu.dot_dimension_numbers<[1], [0], [0], [1], [0, 0, 1, 1], [], []>} : vector<64x24xbf16>, vector<24x8xbf16>, vector<64x8xf32> -> vector<64x8xf32>
    %55 = arith.addf %49, %54 : vector<64x8xf32>
    %56 = vector.extract_strided_slice %6 {offsets = [2, 2, 0], sizes = [8, 8, 24], strides = [1, 1, 1]} : vector<10x10x24xbf16> to vector<8x8x24xbf16>
    %57 = vector.shape_cast %56 : vector<8x8x24xbf16> to vector<64x24xbf16>
    %c8 = arith.constant 8 : index
    %c0_39 = arith.constant 0 : index
    %c0_40 = arith.constant 0 : index
    %58 = vector.load %arg5[%c8, %c0_39, %c0_40] : memref<9x24x8xbf16, #tpu.memory_space<vmem>>, vector<1x24x8xbf16>
    %59 = vector.shape_cast %58 : vector<1x24x8xbf16> to vector<24x8xbf16>
    %cst_41 = arith.constant dense<0.000000e+00> : vector<64x8xf32>
    %60 = tpu.matmul %57, %59, %cst_41 {dimension_numbers = #tpu.dot_dimension_numbers<[1], [0], [0], [1], [0, 0, 1, 1], [], []>} : vector<64x24xbf16>, vector<24x8xbf16>, vector<64x8xf32> -> vector<64x8xf32>
    %61 = arith.addf %55, %60 : vector<64x8xf32>
    %62 = vector.extract_strided_slice %3 {offsets = [1, 1, 0], sizes = [8, 8, 8], strides = [1, 1, 1]} : vector<10x10x8xbf16> to vector<8x8x8xbf16>
    %63 = vector.shape_cast %62 : vector<8x8x8xbf16> to vector<64x8xbf16>
    %64 = arith.extf %63 : vector<64x8xbf16> to vector<64x8xf32>
    %c0_42 = arith.constant 0 : index
    %c0_43 = arith.constant 0 : index
    %65 = vector.load %arg6[%c0_42, %c0_43] : memref<1x8xf32, #tpu.memory_space<vmem>>, vector<1x8xf32>
    %66 = vector.broadcast %65 : vector<1x8xf32> to vector<64x8xf32>
    %67 = arith.addf %61, %66 : vector<64x8xf32>
    %68 = arith.addf %67, %64 : vector<64x8xf32>
    %69 = tpu.transpose %68, [1, 0] : vector<64x8xf32> -> vector<8x64xf32>
    %c0_44 = arith.constant 0 : index
    %c0_45 = arith.constant 0 : index
    %c0_46 = arith.constant 0 : index
    %c0_47 = arith.constant 0 : index
    %70 = vector.load %arg7[%c0_44, %c0_45, %c0_46, %c0_47] : memref<1x1x8x64xf32, #tpu.memory_space<vmem>>, vector<1x1x8x64xf32>
    %71 = vector.shape_cast %70 : vector<1x1x8x64xf32> to vector<8x64xf32>
    %72 = vector.shape_cast %69 : vector<8x64xf32> to vector<1x1x8x64xf32>
    tpu.vector_store %arg7[%c0_44, %c0_45, %c0_46, %c0_47], %72 {strides = array<i32>} : memref<1x1x8x64xf32, #tpu.memory_space<vmem>>, vector<1x1x8x64xf32>,
    return
  }
  func.func @transform_0(%arg0: i32, %arg1: i32) -> (i32, i32, i32, i32, i32) {
    %c0_i32 = arith.constant 0 : i32
    %0 = arith.addi %arg1, %c0_i32 : i32
    %c0_i32_0 = arith.constant 0 : i32
    %c0_i32_1 = arith.constant 0 : i32
    %c0_i32_2 = arith.constant 0 : i32
    %c0_i32_3 = arith.constant 0 : i32
    return %arg0, %0, %c0_i32_0, %c0_i32_1, %c0_i32_2 : i32, i32, i32, i32, i32
  }
  func.func @transform_1(%arg0: i32, %arg1: i32) -> (i32, i32, i32, i32, i32) {
    %c1_i32 = arith.constant 1 : i32
    %0 = arith.addi %arg1, %c1_i32 : i32
    %c0_i32 = arith.constant 0 : i32
    %c0_i32_0 = arith.constant 0 : i32
    %c0_i32_1 = arith.constant 0 : i32
    %c0_i32_2 = arith.constant 0 : i32
    return %arg0, %0, %c0_i32, %c0_i32_0, %c0_i32_1 : i32, i32, i32, i32, i32
  }
  func.func @transform_2(%arg0: i32, %arg1: i32) -> (i32, i32, i32, i32, i32) {
    %c2_i32 = arith.constant 2 : i32
    %0 = arith.addi %arg1, %c2_i32 : i32
    %c0_i32 = arith.constant 0 : i32
    %c0_i32_0 = arith.constant 0 : i32
    %c0_i32_1 = arith.constant 0 : i32
    %c0_i32_2 = arith.constant 0 : i32
    return %arg0, %0, %c0_i32, %c0_i32_0, %c0_i32_1 : i32, i32, i32, i32, i32
  }
  func.func @transform_3(%arg0: i32, %arg1: i32) -> (i32, i32, i32) {
    %c0_i32 = arith.constant 0 : i32
    %c0_i32_0 = arith.constant 0 : i32
    %c0_i32_1 = arith.constant 0 : i32
    %c0_i32_2 = arith.constant 0 : i32
    return %c0_i32, %c0_i32_0, %c0_i32_1 : i32, i32, i32
  }
  func.func @transform_4(%arg0: i32, %arg1: i32) -> (i32, i32) {
    %c0_i32 = arith.constant 0 : i32
    %c0_i32_0 = arith.constant 0 : i32
    %c0_i32_1 = arith.constant 0 : i32
    return %c0_i32, %c0_i32_0 : i32, i32
  }
  func.func @transform_5(%arg0: i32, %arg1: i32) -> (i32, i32, i32, i32) {
    %c0_i32 = arith.constant 0 : i32
    %c0_i32_0 = arith.constant 0 : i32
    %c0_i32_1 = arith.constant 0 : i32
    return %arg0, %arg1, %c0_i32, %c0_i32_0 : i32, i32, i32, i32
  }
}

</mosaic_0001>

<bundles_post_ra>
// kernel: tpu_custom_call.1
= control target key start
LH: loop header
LB: loop body
LE: loop exit
PB: predicated region body
PF: predicated region fallthrough
CT: control target
= control target key end

     0   :  { %10 = vsyncpa [#allocation3], 0  ;;  %s3572_s0 = inlined_call_operand.vmem [shape: bf16[2,6,10,10,8], index: 0, kind: input, shape index: {}]   ;;  %s3573_s1 = inlined_call_operand.vmem [shape: bf16[2,6,10,10,8], index: 1, kind: input, shape index: {}]   ;;  %s3574_s2 = inlined_call_operand.vmem [shape: bf16[2,6,10,10,8], index: 2, kind: input, shape index: {}]   ;;  %s3575_s3 = inlined_call_operand.vmem [shape: bf16[9,24,8], index: 3, kind: input, shape index: {}]   ;;  %s3576_s4 = inlined_call_operand.vmem [shape: f32[1,8], index: 4, kind: input, shape index: {}]   ;;  %s3577_s5 = inlined_call_operand.hbm [shape: f32[2,4,8,64], index: 5, kind: output, shape index: {}]  }
   0x1   :  { %12 = vsyncpa [#allocation3 + $0x1], 0  ;;  %s2785_s18 = smov 0   ;;  %s2787_s19 = smov 0  }
   0x2   :  { %s2789_s20 = smov 0   ;;  %s2791_s21 = smov 0  }
   0x3   :  { %s2793_s22 = smov 0   ;;  %s2795_s23 = smov 0  }
   0x4   :  { %s2797_s24 = smov 0   ;;  %s2799_s25 = smov 0  }
   0x5 LB: > { %s2110_s26 = sadd.s32 4294967295, %s2750_s25   ;;  %s2111_s27 = sadd.s32 4294967294, %s2750_s25   ;;  %s2750_s25 = sphi %s2799_s25, %s18_s25   ;;  %s2746_s24 = sphi %s2797_s24, %s3625_s24   ;;  %s2742_s23 = sphi %s2795_s23, %s3624_s23   ;;  %s2738_s22 = sphi %s2793_s22, %s3623_s22   ;;  %s2734_s21 = sphi %s2791_s21, %s3622_s21   ;;  %s2730_s20 = sphi %s2789_s20, %s3621_s20   ;;  %s2726_s19 = sphi %s2787_s19, %s3620_s19   ;;  %s2722_s18 = sphi %s2785_s18, %s3619_s18  }
   0x6   : > { %s27_s28 = sadd.s32 1, %s2742_s23  ;;  %s30_s29 = sadd.s32 1, %s2746_s24 }
   0x7   : > { %p28_p0 = scmp.ge.s32.totalorder %s27_s28, 4  ;;  %p179_p1 = scmp.ne.s32.totalorder %s2730_s20, %s2726_s19 }
   0x8   : > { %p180_p2 = scmp.eq.s32.totalorder %s2110_s26, 7  ;;  %p185_p5 = scmp.ne.s32.totalorder %s2726_s19, %s2722_s18 }
   0x9   : > { %s3627_s28 = smov (%p28_p0, %s27_s28), 0  ;;  %s3629_s29 = smov (!%p28_p0, %s30_s29), %s2746_s24 }
   0xa   : > { %s165_s30 = ssub.s32 %s2742_s23, %s3627_s28  ;;  %p2836_p3 = por %p180_p2, %p179_p1 }
   0xb   : > { %p32_p4 = scmp.ge.s32.totalorder %s3629_s29, 2  ;;  %p186_p6 = scmp.eq.s32.totalorder %s2111_s27, 7 }
   0xc   : > { %p2114_p7 = scmp.ge.s32.totalorder %s2750_s25, 1  ;;  %p250_p9 = scmp.lt.s32.totalorder %s2750_s25, 9 }
   0xd   : > { %s3631_s29 = smov (%p32_p4, %s3629_s29), 0  ;;  %p2845_p8 = por %p186_p6, %p185_p5 }
   0xe   : > { %s164_s8 = ssub.s32 %s2746_s24, %s3631_s29  ;;  %s169_s9 = sadd.s32 1, %s2730_s20 }
   0xf   : > { %s166_s10 = sor.u32 %s165_s30, %s164_s8  ;;  %p251_p10 = pnand %p2114_p7, %p250_p9 }
  0x10   : > { %p167_p11 = scmp.eq.s32.totalorder %s166_s10, 0 }
  0x11   : > { %254 = sbr.rel (%p251_p10) target bundleno = 610 (0x262), region = 40 }
  0x12   : > { %s2854_s11 = scalar_select %p167_p11, %s2730_s20, %s169_s9  }
  0x18   : > { %p302_p12 = scmp.lt.s32.totalorder %s2738_s22, 1  ;;  %s311_s12 = sadd.s32 1, %s2734_s21  ;;  %v2950_v26 = vld [vmem:[%s3575_s3 + $0x30] sm:$0xff]   ;;  %vm832_vm0 = vcmask 1043456   ;;  %v2987_v37 = vld [vmem:[%s3575_s3 + $0x38] ss:$0 sps:$4 sm:$0xff]  }
  0x19   : > { %p314_p13 = scmp.lt.s32.totalorder %s311_s12, 5  ;;  %s322_s15 = sadd.s32 2, %s2734_s21  ;;  %2392 = vmatprep.subr.bf16.mxu0 %v2950_v26  ;;  %v2636_v29 = vld [vmem:[%s3575_s3 + $0xc] sm:$0xff]   ;;  %v2639_v39 = vld [vmem:[%s3575_s3 + $0x14] ss:$0 sps:$4 sm:$0xff]   ;;  %v2998_v40 = vsel %vm832_vm0, %v2987_v37, 0 }
  0x1a   : > { %s303_s13 = scalar_select %p302_p12, %s2738_s22, 1  ;;  %2393 = vmatpush3.bf16.msra.mxu0 %v2950_v26  ;;  %2344 = vmatprep.subr.bf16.mxu1 %v2636_v29  ;;  %v3003_v41 = vld [vmem:[%s3575_s3 + $0x3c] sm:$0xff]   ;;  %v834_v42 = vsel %vm832_vm0, %v2639_v39, 0  ;;  %vm584_vm1 = vcmask 64512   ;;  %vm615_vm2 = vcmask 130048   ;;  %vm819_vm5 = vcmask 195584  }
  0x1b   : > { %s3633_s12 = smov (!%p314_p13, %s311_s12), 5  ;;  %p325_p0 = scmp.lt.s32.totalorder %s322_s15, 5  ;;  %2345 = vmatpush3.bf16.msra.mxu1 %v2636_v29  ;;  %2524 = vmatprep.subr.msk.bf16.mxu0 %vm832_vm0, %v2987_v37  ;;  %v3014_v43 = vld [vmem:[%s3575_s3] sm:$0xff]   ;;  %vm679_vm3 = vsmask.f32 3328  ;;  %vm994_vm6 = vcmask 1042432  }
  0x1c   : > { %s2859_s14 = smul.u32 120, %s303_s13  ;;  %s2752_s9 = smov 8   ;;  %2520 = vmatprep.subr.msk.bf16.mxu1 %vm832_vm0, %v2639_v39  ;;  %vm680_vm4 = vsmask.f32 7440  ;;  %vm995_vm7 = vcmask 1046532   ;;  %vm1969_vm10 = vcmask 523264  }
  0x1d   : > { %s2532_s16 = smul.u32 20, %s3633_s12  ;;  %s3635_s15 = smov (!%p325_p0, %s322_s15), 5  ;;  %vm3128_vm8 = vmor %vm679_vm3, %vm680_vm4 }
  0x1e   : > { %s2533_s10 = smul.u32 20, %s3635_s15  ;;  %p304_p1 = scmp.lt.s32.totalorder %s2734_s21, 5  ;;  %2395 = vmatpush3.bf16.msra.mxu0 %v2998_v40  ;;  %vm3185_vm9 = vmor %vm994_vm6, %vm995_vm7 }
  0x1f   : > { %s318_s17 = sadd.s32 %s2532_s16, %s2859_s14  ;;  %2347 = vmatpush3.bf16.msra.mxu1 %v834_v42  ;;  %2404 = vmatprep.subr.bf16.mxu0 %v3003_v41 }
  0x20   : > { %s2117_s26 = sshll.u32 %s318_s17, 2  ;;  %s329_s12 = sadd.s32 %s2533_s10, %s2859_s14  ;;  %2356 = vmatprep.subr.bf16.mxu1 %v3014_v43 }
  0x21   : > { %s2866_s8 = scalar_lea.vmem %s3573_s1, %s2117_s26  ;;  %s2118_s13 = sshll.u32 %s329_s12, 2 }
  0x22   : > { %v2869_v0 = vld [vmem:[%s2866_s8 + $0x10] sm:$0xf]  ;;  %v2872_v1 = vld [vmem:[%s2866_s8 + $0x14] sm:$0x1]  ;;  %v2609_v3 = vld [vmem:[%s2866_s8] sm:$0x1f]   ;;  %s2906_s15 = scalar_lea.vmem %s3574_s2, %s2118_s13 }
  0x23   : > { %v2131_v2 = vcombine.low %v2869_v0, %v2872_v1  ;;  %v2878_v4 = vld [vmem:[%s2866_s8 + $0x18] sm:$0xf]  ;;  %v2881_v5 = vld [vmem:[%s2866_s8 + $0x1c] sm:$0x1]  ;;  %v2887_v7 = vld [vmem:[%s2866_s8 + $0x8] sm:$0xf]  ;;  %494 = vrot.lane.b32.xlu0 %v2609_v3, %s2752_s9 }
  0x24   : > { %3592 = vst [vmem:[#allocation5_spill] sm:$0xff] %v2881_v5  ;;  %v2132_v6 = vcombine.low %v2878_v4, %v2881_v5  ;;  %v2891_v8 = vld [vmem:[%s2866_s8 + $0xc] sm:$0x1]  ;;  %v2897_v10 = vld [vmem:[%s2866_s8 + $0x20] sm:$0xf]  ;;  %s2753_s26 = smov 16  }
  0x25   : > { %498 = vrot.lane.b32.xlu1 %v2131_v2, %s2752_s9  ;;  %v2130_v9 = vcombine.low %v2887_v7, %v2891_v8  ;;  %v2900_v11 = vld [vmem:[%s2866_s8 + $0x24] sm:$0x1]  ;;  %v2614_v14 = vld [vmem:[%s2906_s15 + $0x10] sm:$0x1f]   ;;  %v2615_v15 = vld [vmem:[%s2906_s15 + $0x8] sm:$0x1f]  }
  0x26   : > { %3593 = vst [vmem:[#allocation6_spill] sm:$0xff] %v2900_v11  ;;  %v2612_v12 = vld [vmem:[%s2906_s15] sm:$0x1f]   ;;  %v2133_v13 = vcombine.low %v2897_v10, %v2900_v11  ;;  %s305_s27 = scalar_select %p304_p1, %s2734_s21, 5  ;;  %v2617_v17 = vld [vmem:[%s2906_s15 + $0x18] sm:$0x1f]  }
  0x27   : > { %496 = vrot.lane.b32.xlu0 %v2130_v9, %s2752_s9  ;;  %v2616_v16 = vld [vmem:[%s2906_s15 + $0x20] sm:$0x1f]   ;;  %v2922_v18 = vld [vmem:[%s2866_s8 + $0x30] sm:$0xf]  ;;  %v2926_v19 = vld [vmem:[%s2866_s8 + $0x34] sm:$0x1] }
  0x28   : > { %3594 = vst [vmem:[#allocation7_spill] sm:$0xff] %v2922_v18  ;;  %3595 = vst [vmem:[#allocation8_spill] sm:$0xff] %v2926_v19  ;;  %s2530_s30 = smul.u32 20, %s305_s27  ;;  %v2929_v20 = vld [vmem:[%s2866_s8 + $0x28] sm:$0xf]  ;;  %v2135_v22 = vcombine.low %v2922_v18, %v2926_v19 }
  0x29   : > { %500 = vrot.lane.b32.xlu1 %v2132_v6, %s2752_s9  ;;  %v2932_v21 = vld [vmem:[%s2866_s8 + $0x2c] sm:$0x1]  ;;  %v2941_v24 = vld [vmem:[%s2866_s8 + $0x38] sm:$0xf]  ;;  %v2945_v25 = vld [vmem:[%s2866_s8 + $0x3c] sm:$0x1] }
  0x2a   : > { %3596 = vst [vmem:[#allocation9_spill] sm:$0xff] %v2932_v21  ;;  %v2134_v23 = vcombine.low %v2929_v20, %v2932_v21  ;;  %3597 = vst [vmem:[#allocation10_spill] sm:$0xff] %v2941_v24  ;;  %s308_s10 = sadd.s32 %s2859_s14, %s2530_s30  ;;  %v2620_v27 = vld [vmem:[%s2906_s15 + $0x28] sm:$0x1f]   ;;  %v2136_v28 = vcombine.low %v2941_v24, %v2945_v25  ;;  %v2622_v30 = vld [vmem:[%s2906_s15 + $0x38] sm:$0x1f]  }
  0x2b   : > { %502 = vrot.lane.b32.xlu0 %v2133_v13, %s2752_s9  ;;  %3598 = vst [vmem:[#allocation11_spill] sm:$0xff] %v2945_v25  ;;  %s2116_s16 = sshll.u32 %s308_s10, 2  ;;  %v2623_v31 = vld [vmem:[%s2906_s15 + $0x30] sm:$0x1f]   ;;  %v2972_v32 = vld [vmem:[%s2866_s8 + $0x40] sm:$0xf] }
  0x2c   : > { %s2966_s10 = scalar_lea.vmem %s3572_s0, %s2116_s16  ;;  %3599 = vst [vmem:[#allocation12_spill] sm:$0xff] %v2972_v32  ;;  %v2975_v33 = vld [vmem:[%s2866_s8 + $0x44] sm:$0x1]  ;;  %v2627_v36 = vld [vmem:[%s2906_s15 + $0x48] sm:$0x1f]   ;;  %s299_s30 = sand.u32 1, %s2726_s19  }
  0x2d   : > { %564 = vrot.lane.b32.xlu1 %v2612_v12, %s2753_s26  ;;  %3600 = vst [vmem:[#allocation13_spill] sm:$0xff] %v2975_v33  ;;  %v2625_v34 = vld [vmem:[%s2906_s15 + $0x40] sm:$0x1f]   ;;  %v2137_v35 = vcombine.low %v2972_v32, %v2975_v33  ;;  %v2626_v38 = vld [vmem:[%s2866_s8 + $0x48] sm:$0x1f]   ;;  %s2115_s12 = sshll.u32 %s299_s30, 3 }
  0x2e   : > { %v2629_v46 = vld [vmem:[%s2966_s10] sm:$0x1f]   ;;  %v2628_v51 = vld [vmem:[%s2966_s10 + $0x10] sm:$0x1f]   ;;  %v2631_v54 = vld [vmem:[%s2966_s10 + $0x8] sm:$0x1f]  }
  0x2f   : > { %566 = vrot.lane.b32.xlu0 %v2615_v15, %s2753_s26  ;;  %v2632_v56 = vld [vmem:[%s2966_s10 + $0x20] sm:$0x1f]   ;;  %v2630_v60 = vld [vmem:[%s2966_s10 + $0x18] sm:$0x1f]   ;;  %s301_s14 = scalar_lea.vmem [#allocation2], %s2115_s12 }
  0x30   : > { %s1987_s15 = sshll.u32 %s301_s14, 4  ;;  %s3521_s15 = int_to_ptr.vmem [resolvable:$true] %s1987_s15 }
  0x31   : > { %568 = vrot.lane.b32.xlu1 %v2614_v14, %s2753_s26 }
  0x33   : > { %570 = vrot.lane.b32.xlu0 %v2617_v17, %s2753_s26 }
  0x35   : > { %572 = vrot.lane.b32.xlu1 %v2616_v16, %s2753_s26  ;;  %v3053_v16 = vld [vmem:[%s3575_s3 + $0x8] ss:$0 sps:$4 sm:$0xff]  }
  0x36   : > { %v3081_v39 = vsel %vm832_vm0, %v3053_v16, 0 }
  0x37   : > { %504 = vrot.lane.b32.xlu0 %v2134_v23, %s2752_s9 }
  0x39   : > { %506 = vrot.lane.b32.xlu1 %v2135_v22, %s2752_s9 }
  0x3b   : > { %508 = vrot.lane.b32.xlu0 %v2136_v28, %s2752_s9 }
  0x3d   : > { %574 = vrot.lane.b32.xlu1 %v2620_v27, %s2753_s26 }
  0x3f   : > { %576 = vrot.lane.b32.xlu0 %v2623_v31, %s2753_s26  ;;  %v2634_v31 = vld [vmem:[%s2966_s10 + $0x28] sm:$0x1f]  }
  0x41   : > { %578 = vrot.lane.b32.xlu1 %v2622_v30, %s2753_s26 }
  0x43   : > { %510 = vrot.lane.b32.xlu0 %v2137_v35, %s2752_s9 }
  0x45   : > { %580 = vrot.lane.b32.xlu1 %v2625_v34, %s2753_s26 }
  0x47   : > { %512 = vrot.lane.b32.xlu0 %v2626_v38, %s2752_s9  ;;  %s1972_s9 = scalar_lea.sflag [#allocation3], %s299_s30 }
  0x49   : > { %582 = vrot.lane.b32.xlu1 %v2627_v36, %s2753_s26  ;;  %s2656_s26 = scalar_lea.vmem %s3521_s15, 128 }
  0x4a   : > { %p2657_p2 = scmp.ne.s32.totalorder %s3521_s15, %s2656_s26 }
  0x4c   : > { %p2658_p4 = pnand %p2657_p2, %p2836_p3 }
  0x4e   : > { %p2659_p5 = pneg %p2658_p4 }
  0x95   : > { %v495_v45 = vpop.permute.xlu0 %494 }
  0x96   : > { %v587_v49 = vsel %vm584_vm1, %v2629_v46, %v495_v45 }
  0x97   : > { %v499_v44 = vpop.permute.xlu1 %498 }
  0x98   : > { %v593_v58 = vsel %vm584_vm1, %v2628_v51, %v499_v44 }
  0x99   : > { %v497_v48 = vpop.permute.xlu0 %496 }
  0x9a   : > { %v590_v61 = vsel %vm584_vm1, %v2631_v54, %v497_v48 }
  0x9b   : > { %v501_v47 = vpop.permute.xlu1 %500 }
  0x9c   : > { %v596_v17 = vsel %vm584_vm1, %v2630_v60, %v501_v47 }
  0x9d   : > { %v503_v53 = vpop.permute.xlu0 %502 }
  0x9e   : > { %v599_v6 = vsel %vm584_vm1, %v2632_v56, %v503_v53 }
  0x9f   : > { %v565_v50 = vpop.permute.xlu1 %564 }
  0xa0   : > { %v3021_v52 = vsel %vm615_vm2, %v587_v49, %v565_v50 }
  0xa1   : > { %v3026_v55 = vcombine.low %v3021_v52, %v3021_v52  ;;  %v567_v59 = vpop.permute.xlu0 %566  ;;  %v3043_v12 = vcombine.high %v3021_v52, %v3021_v52 }
  0xa2   : > { %v3036_v63 = vsel %vm615_vm2, %v590_v61, %v567_v59 }
  0xa3   : > { %v569_v57 = vpop.permute.xlu1 %568  ;;  %v683_v2 = vshrl.u32 %v3026_v55, 16  ;;  %v686_v3 = vshll.u32 %v3026_v55, 16  ;;  %v3058_v22 = vcombine.low %v3036_v63, %v3036_v63  ;;  %v692_v34 = vshll.u32 %v3043_v12, 16 }
  0xa4   : > { %v3033_v62 = vsel %vm615_vm2, %v593_v58, %v569_v57  ;;  %v3089_v44 = vcombine.high %v3036_v63, %v3036_v63 }
  0xa5   : > { %v571_v15 = vpop.permute.xlu0 %570  ;;  %v685_v27 = vrot.slane %v683_v2, 4  ;;  %v688_v28 = vrot.slane %v686_v3, 5  ;;  %v3073_v35 = vcombine.low %v3033_v62, %v3033_v62  ;;  %v3085_v42 = vcombine.high %v3033_v62, %v3033_v62  ;;  %v2637_v3 = vld [vmem:[%s2966_s10 + $0x38] sm:$0x1f]  }
  0xa6   : > { %v3061_v23 = vsel %vm615_vm2, %v596_v17, %v571_v15  ;;  %v697_v49 = vshrl.u32 %v3058_v22, 16  ;;  %v700_v50 = vshll.u32 %v3058_v22, 16  ;;  %v694_v58 = vrot.slane %v692_v34, 5 }
  0xa7   : > { %v573_v9 = vpop.permute.xlu1 %572  ;;  %v3077_v36 = vcombine.low %v3061_v23, %v3061_v23  ;;  %v689_v57 = vor.u32 %v688_v28, %v685_v27  ;;  %v3107_v60 = vcombine.high %v3061_v23, %v3061_v23  ;;  %v706_v34 = vshll.u32 %v3089_v44, 16 }
  0xa8   : > { %v3048_v14 = vsel %vm615_vm2, %v599_v6, %v573_v9  ;;  %v699_v28 = vrot.slane %v697_v49, 4  ;;  %v711_v6 = vshrl.u32 %v3073_v35, 16 }
  0xa9   : > { %v3065_v29 = vcombine.low %v3048_v14, %v3048_v14  ;;  %v505_v38 = vpop.permute.xlu0 %504  ;;  %v3093_v45 = vcombine.high %v3048_v14, %v3048_v14  ;;  %v725_v47 = vshrl.u32 %v3077_v36, 16  ;;  %v728_v48 = vshll.u32 %v3077_v36, 16 }
  0xaa   : > { %v602_v54 = vsel %vm584_vm1, %v2634_v31, %v505_v38  ;;  %v702_v31 = vrot.slane %v700_v50, 5  ;;  %v690_v46 = vrot.slane %v689_v57, 4  ;;  %v734_v13 = vshll.u32 %v3107_v60, 16  ;;  %v2633_v38 = vld [vmem:[%s2966_s10 + $0x30] sm:$0x1f]  }
  0xab   : > { %v3067_v30 = vpop.permute.xlu1 %506  ;;  %v739_v51 = vshrl.u32 %v3065_v29, 16  ;;  %v742_v53 = vshll.u32 %v3065_v29, 16  ;;  %v748_v9 = vshll.u32 %v3093_v45, 16  ;;  %v727_v15 = vrot.slane %v725_v47, 4 }
  0xac   : > { %v730_v27 = vrot.slane %v728_v48, 5  ;;  %v703_v59 = vor.u32 %v702_v31, %v699_v28  ;;  %v713_v28 = vrot.slane %v711_v6, 4  ;;  %v736_v24 = vrot.slane %v734_v13, 5 }
  0xad   : > { %v509_v2 = vpop.permute.xlu0 %508  ;;  %v750_v49 = vrot.slane %v748_v9, 5  ;;  %v720_v9 = vshll.u32 %v3085_v42, 16  ;;  %v695_v21 = vsel %vm3128_vm8, %v690_v46, %v694_v58  ;;  %v605_v13 = vsel %vm584_vm1, %v2633_v38, %v3067_v30 }
  0xae   : > { %v608_v47 = vsel %vm584_vm1, %v2637_v3, %v509_v2  ;;  %v704_v2 = vrot.slane %v703_v59, 4  ;;  %v708_v3 = vrot.slane %v706_v34, 5  ;;  %v731_v31 = vor.u32 %v730_v27, %v727_v15 }
  0xaf   : > { %v575_v56 = vpop.permute.xlu1 %574  ;;  %v1003_v15 = vrot.slane %v3089_v44, 5  ;;  %v1015_v30 = vrot.slane %v3093_v45, 5  ;;  %v2191_v38 = vrot.slane %v3077_v36, 9 }
  0xb0   : > { %v3110_v61 = vsel %vm615_vm2, %v602_v54, %v575_v56  ;;  %v741_v54 = vrot.slane %v739_v51, 4  ;;  %v744_v56 = vrot.slane %v742_v53, 5  ;;  %v714_v53 = vshll.u32 %v3073_v35, 16 }
  0xb1   : > { %v3117_v17 = vcombine.low %v3110_v61, %v3110_v61  ;;  %v577_v57 = vpop.permute.xlu0 %576  ;;  %v709_v11 = vsel %vm3128_vm8, %v704_v2, %v708_v3  ;;  %v732_v5 = vrot.slane %v731_v31, 4 }
  0xb2   : > { %v716_v25 = vrot.slane %v714_v53, 5  ;;  %v745_v32 = vor.u32 %v744_v56, %v741_v54  ;;  %v2168_v18 = vcombine.low %v695_v21, %v709_v11  ;;  %v2192_v54 = vrot.slane %v3065_v29, 9 }
  0xb3   : > { %v579_v48 = vpop.permute.xlu1 %578  ;;  %v753_v50 = vshrl.u32 %v3117_v17, 16  ;;  %v756_v33 = vshll.u32 %v3117_v17, 16  ;;  %v737_v46 = vsel %vm3128_vm8, %v732_v5, %v736_v24  ;;  %v3164_v5 = vsel %vm615_vm2, %v605_v13, %v577_v57  ;;  %v2641_v24 = vld [vmem:[%s2966_s10 + $0x40] sm:$0x1f]  }
  0xb4   : > { %v3136_v19 = vsel %vm615_vm2, %v608_v47, %v579_v48  ;;  %v717_v59 = vor.u32 %v716_v25, %v713_v28  ;;  %v746_v34 = vrot.slane %v745_v32, 4  ;;  %2348 = vmatprep.mubr.msk.bf16.mxu1 %vm819_vm5, %v2168_v18  ;;  %v722_v25 = vrot.slane %v720_v9, 5  ;;  %v2642_v28 = vld [vmem:[%s3575_s3 + $0x44] ss:$0 sps:$4 sm:$0xff]  }
  0xb5   : > { %v3144_v6 = vcombine.low %v3136_v19, %v3136_v19  ;;  %v3149_v27 = vrot.slane %v753_v50, 4  ;;  %v3153_v58 = vrot.slane %v756_v33, 5  ;;  %v511_v44 = vpop.permute.xlu0 %510  ;;  %v3173_v47 = vcombine.low %v3164_v5, %v3164_v5  ;;  %v2643_v50 = vld [vmem:[%s2966_s10 + $0x48] sm:$0x1f]   ;;  %s2286_s10 = sshll.u32 %s2738_s22, 2 }
  0xb6   : > { %v718_v21 = vrot.slane %v717_v59, 4  ;;  %v3158_v32 = vsel %vm3128_vm8, %v746_v34, %v750_v49  ;;  %v3177_v29 = vcombine.high %v3110_v61, %v3110_v61  ;;  %v3193_v2 = vcombine.high %v3136_v19, %v3136_v19  ;;  %s1983_s13 = sadd.s32 %s2734_s21, %s2286_s10  ;;  %s2754_s21 = smov [#allocation2]  }
  0xb7   : > { %v2228_v33 = vcombine.low %v737_v46, %v3158_v32  ;;  %v781_v56 = vshrl.u32 %v3144_v6, 16  ;;  %v784_v48 = vshll.u32 %v3144_v6, 16  ;;  %v581_v49 = vpop.permute.xlu1 %580  ;;  %v759_v57 = vor.u32 %v3153_v58, %v3149_v27  ;;  %s2287_s16 = sshll.u32 %s1983_s13, 7  ;;  %s2660_s22 = sshll.u32 %s2754_s21, 4  ;;  %s2661_s22 = int_to_ptr.vmem [resolvable:$false] %s2660_s22 }
  0xb8   : > { %v723_v18 = vsel %vm3128_vm8, %v718_v21, %v722_v25  ;;  %v767_v3 = vshrl.u32 %v3173_v47, 16  ;;  %v1011_v9 = vrot.slane %v3107_v60, 5  ;;  %v2162_v59 = vcombine.high %v3164_v5, %v3164_v5  ;;  %s3519_s27 = scalar_lea.hbm %s3577_s5, %s2287_s16  ;;  %s2662_s12 = scalar_lea.vmem %s2661_s22, 256 }
  0xb9   : > { %v3179_v36 = vcombine.low %v723_v18, %v737_v46  ;;  %v2227_v45 = vcombine.low %v709_v11, %v723_v18  ;;  %v770_v11 = vshll.u32 %v3173_v47, 16  ;;  %v513_v31 = vpop.permute.xlu0 %512  ;;  %v611_v34 = vsel %vm584_vm1, %v2641_v24, %v511_v44  ;;  %p2663_p6 = scmp.lt.s32.totalorder %s3521_s15, %s2661_s22  ;;  %p2664_p7 = scmp.lt.s32.totalorder %s2662_s12, %s2656_s26 }
  0xba   : > { %v3605_v13 = vrot.slane %v3058_v22, 9  ;;  %v783_v46 = vrot.slane %v781_v56, 4  ;;  %v769_v58 = vrot.slane %v767_v3, 4  ;;  %v3606_v60 = vrot.slane %v3085_v42, 5 }
  0xbb   : > { %2396 = vmatprep.mubr.msk.bf16.mxu0 %vm819_vm5, %v2227_v45  ;;  %2349 = vmatmul.mubr.msk.bf16.vlgmr.msra.gmra.mrb[0].mxu1 %vm819_vm5, %v3179_v36  ;;  %v772_v21 = vrot.slane %v770_v11, 5  ;;  %v3607_v25 = vrot.slane %v3073_v35, 9  ;;  %v786_v22 = vrot.slane %v784_v48, 5  ;;  %v3227_v44 = vsel %vm615_vm2, %v611_v34, %v581_v49  ;;  %v583_v42 = vpop.permute.xlu1 %582  ;;  %v3233_v35 = vld [vmem:[%s3575_s3 + $0x18] sm:$0xff]   ;;  %p2665_p9 = por %p2664_p7, %p2663_p6 }
  0xbc   : > { %v3211_v27 = vsel %vm3185_vm9, %v3605_v13, %v1003_v15  ;;  %2397 = vmatmul.mubr.msk.bf16.vlgmr.msra.gmra.mrb[0].mxu0 %vm819_vm5, %v2228_v33  ;;  %2357 = vmatpush3.bf16.msra.mxu1 %v3014_v43  ;;  %v614_v24 = vsel %vm584_vm1, %v2643_v50, %v513_v31  ;;  %v1407_v43 = vsel %vm832_vm0, %v2642_v28, 0  ;;  %v3242_v56 = vsel %vm3185_vm9, %v2192_v54, %v1015_v30 }
  0xbd   : > { %v3220_v18 = vsel %vm3185_vm9, %v3607_v25, %v3606_v60  ;;  %2405 = vmatpush3.bf16.msra.mxu0 %v3003_v41  ;;  %v773_v33 = vor.u32 %v772_v21, %v769_v58  ;;  %v2645_v41 = vld [vmem:[%s3575_s3 + $0x48] sm:$0xff]   ;;  %v762_v45 = vshll.u32 %v3177_v29, 16  ;;  %v2193_v48 = vrot.slane %v3117_v17, 9  ;;  %2521 = vmatprep.subr.msk.bf16.mxu1 %vm832_vm0, %v3053_v16  ;;  %p2666_p10 = pnand %p2665_p9, %p2659_p5 }
  0xbe   : > { %v2241_v15 = vcombine.low %v3211_v27, %v3220_v18  ;;  %2526 = vmatprep.subr.msk.bf16.mxu0 %vm832_vm0, %v2642_v28  ;;  %v776_v49 = vshll.u32 %v2162_v59, 16  ;;  %v790_v50 = vshll.u32 %v3193_v2, 16  ;;  %v3252_v3 = vcombine.low %v3227_v44, %v3227_v44 }
  0xbf   : > { %v3256_v54 = vcombine.high %v3227_v44, %v3227_v44  ;;  %v3259_v30 = vsel %vm615_vm2, %v614_v24, %v583_v42  ;;  %v787_v17 = vor.u32 %v786_v22, %v783_v46  ;;  %v3264_v11 = vsel %vm3185_vm9, %v2191_v38, %v1011_v9 }
  0xc0   : > { %2408 = vmatprep.mubr.msk.bf16.mxu0 %vm819_vm5, %v2241_v15  ;;  %2359 = vmatpush3.bf16.msra.mxu1 %v3081_v39  ;;  %v760_v16 = vrot.slane %v759_v57, 4  ;;  %v774_v28 = vrot.slane %v773_v33, 4  ;;  %v1019_v31 = vrot.slane %v3177_v29, 5  ;;  %v2194_v34 = vrot.slane %v3173_v47, 9  ;;  %v2647_v33 = vld [vmem:[%s3575_s3 + $0x50] ss:$0 sps:$4 sm:$0xff]  }
  0xc1   : > { %2407 = vmatpush3.bf16.msra.mxu0 %v1407_v43  ;;  %2368 = vmatprep.subr.bf16.mxu1 %v3233_v35  ;;  %v1023_v13 = vrot.slane %v2162_v59, 5  ;;  %v3271_v58 = vcombine.high %v3259_v30, %v3259_v30  ;;  %v764_v39 = vrot.slane %v762_v45, 5  ;;  %v778_v46 = vrot.slane %v776_v49, 5 }
  0xc2   : > { %2416 = vmatprep.subr.bf16.mxu0 %v2645_v41  ;;  %v3275_v38 = vcombine.low %v3259_v30, %v3259_v30  ;;  %v792_v57 = vrot.slane %v790_v50, 5  ;;  %v2242_v9 = vcombine.low %v3264_v11, %v3242_v56  ;;  %v2237_v29 = vrot.slane %v3252_v3, 9 }
  0xc3   : > { %v1374_v47 = vrot.slane %v3256_v54, 5  ;;  %v3284_v21 = vsel %vm3128_vm8, %v760_v16, %v764_v39  ;;  %v3288_v60 = vsel %vm3128_vm8, %v774_v28, %v778_v46  ;;  %v788_v25 = vrot.slane %v787_v17, 4 }
  0xc4   : > { %v2273_v59 = vrot.slane %v3275_v38, 9  ;;  %v1690_v22 = vrot.slane %v3271_v58, 5  ;;  %v3293_v15 = vcombine.low %v3158_v32, %v3284_v21  ;;  %v3297_v24 = vsel %vm3185_vm9, %v2193_v48, %v1019_v31 }
  0xc5   : > { %v3301_v42 = vsel %vm3185_vm9, %v2194_v34, %v1023_v13  ;;  %v3308_v43 = vsel %vm3128_vm8, %v788_v25, %v792_v57  ;;  %v2178_v48 = vcombine.low %v3021_v52, %v3036_v63  ;;  %v2195_v49 = vrot.slane %v3144_v6, 9  ;;  %v2649_v52 = vld [vmem:[%s3575_s3 + $0x54] sm:$0xff]   ;;  %v2650_v34 = vld [vmem:[%s3575_s3 + $0x20] ss:$0 sps:$4 sm:$0xff]  }
  0xc6   : > { %v2243_v32 = vcombine.low %v3297_v24, %v3301_v42  ;;  %2352 = vmatprep.mubr.msk.bf16.mxu1 %vm819_vm5, %v3293_v15  ;;  %v3316_v45 = vcombine.low %v3288_v60, %v3308_v43  ;;  %v1027_v50 = vrot.slane %v3193_v2, 5  ;;  %v3329_v17 = vsel %vm3185_vm9, %v2237_v29, %v1374_v47  ;;  %v2651_v29 = vld [vmem:[%s3575_s3 + $0x5c] ss:$0 sps:$4 sm:$0xff]  }
  0xc7   : > { %v1502_v16 = vsel %vm832_vm0, %v2647_v33, 0  ;;  %v3337_v6 = vsel %vm3185_vm9, %v2273_v59, %v1690_v22  ;;  %v2179_v31 = vcombine.low %v3033_v62, %v3061_v23  ;;  %v2180_v13 = vcombine.low %v3048_v14, %v3110_v61  ;;  %v2653_v59 = vld [vmem:[%s3575_s3 + $0x60] sm:$0xff]  }
  0xc8   : > { %2409 = vmatmul.mubr.msk.bf16.vlgmr.msra.gmra.mrb[0].mxu0 %vm819_vm5, %v2242_v9  ;;  %2353 = vmatmul.mubr.msk.bf16.gmra.mrb[4].mxu1 %vm819_vm5, %v3316_v45  ;;  %v2277_v2 = vcombine.low %v3329_v17, %v3337_v6  ;;  %v2188_v39 = vrot.slane %v3026_v55, 9  ;;  %v999_v46 = vrot.slane %v3043_v12, 5  ;;  %v1067_v57 = vsel %vm832_vm0, %v2650_v34, 0  ;;  %v2652_v9 = vld [vmem:[%s3575_s3 + $0x24] sm:$0xff]  }
  0xc9   : > { %2417 = vmatpush3.bf16.msra.mxu0 %v2645_v41  ;;  %2412 = vmatprep.mubr.msk.bf16.mxu0 %vm819_vm5, %v2243_v32  ;;  %v1028_v41 = vsel %vm3185_vm9, %v2195_v49, %v1027_v50  ;;  %v2181_v47 = vcombine.low %v3164_v5, %v3136_v19  ;;  %v1581_v25 = vshrl.u32 %v3275_v38, 16  ;;  %v1584_v53 = vshll.u32 %v3275_v38, 16  ;;  %v2654_v38 = vld [vmem:[%s3575_s3 + $0x2c] ss:$0 sps:$4 sm:$0xff]  }
  0xca   : > { %2527 = vmatprep.subr.msk.bf16.mxu0 %vm832_vm0, %v2647_v33  ;;  %2360 = vmatprep.mubr.msk.bf16.mxu1 %vm819_vm5, %v2178_v48  ;;  %v2244_v28 = vcombine.low %v1028_v41, %v3329_v17  ;;  %v1000_v55 = vsel %vm3185_vm9, %v2188_v39, %v999_v46  ;;  %v1256_v22 = vshll.u32 %v3252_v3, 16  ;;  %v2254_v33 = vcombine.low %v3227_v44, %v3259_v30 }
  0xcb   : > { %v2199_v12 = vcombine.low %v1000_v55, %v3211_v27  ;;  %v1253_v27 = vshrl.u32 %v3252_v3, 16  ;;  %v1583_v32 = vrot.slane %v1581_v25, 4  ;;  %v1586_v48 = vrot.slane %v1584_v53, 5 }
  0xcc   : > { %v2200_v49 = vcombine.low %v3220_v18, %v3264_v11  ;;  %v2201_v3 = vcombine.low %v3242_v56, %v3297_v24  ;;  %v1174_v18 = vsel %vm832_vm0, %v2654_v38, 0  ;;  %v2655_v56 = vld [vmem:[%s3575_s3 + $0x68] ss:$0 sps:$4 sm:$0xff]  }
  0xcd   : > { %2419 = vmatpush3.bf16.msra.mxu0 %v1502_v16  ;;  %v1255_v50 = vrot.slane %v1253_v27, 4  ;;  %v1258_v16 = vrot.slane %v1256_v22, 5  ;;  %v1587_v30 = vor.u32 %v1586_v48, %v1583_v32  ;;  %v3611_v22 = vld [vmem:[#allocation5_spill] sm:$0xff]  ;;  %v3612_v32 = vld [vmem:[#allocation6_spill] sm:$0xff] }
  0xce   : > { %2428 = vmatprep.subr.bf16.mxu0 %v2649_v52  ;;  %v1838_v48 = vshll.u32 %v3612_v32, 16 }
  0xcf   : > { %v1259_v11 = vor.u32 %v1258_v16, %v1255_v50 }
  0xd0   : > { %2413 = vmatmul.mubr.msk.bf16.gmra.mrb[4].mxu0 %vm819_vm5, %v2244_v28  ;;  %2361 = vmatmul.mubr.msk.bf16.vlgmr.msra.gmra.mrb[0].mxu1 %vm819_vm5, %v2179_v31  ;;  %v1262_v28 = vshll.u32 %v3256_v54, 16 }
  0xd1   : > { %2420 = vmatprep.mubr.msk.bf16.mxu0 %vm819_vm5, %v2179_v31  ;;  %2364 = vmatprep.mubr.msk.bf16.mxu1 %vm819_vm5, %v2180_v13  ;;  %v2202_v31 = vcombine.low %v3301_v42, %v1028_v41  ;;  %v1260_v54 = vrot.slane %v1259_v11, 4  ;;  %v3608_v42 = vcombine.low %v3036_v63, %v3033_v62  ;;  %v3609_v62 = vcombine.low %v3061_v23, %v3048_v14 }
  0xd2   : > { %2369 = vmatpush3.bf16.msra.mxu1 %v3233_v35  ;;  %v1613_v35 = vsel %vm832_vm0, %v2651_v29, 0  ;;  %v2215_v63 = vcombine.low %v3136_v19, %v3227_v44  ;;  %v1801_v19 = vshrl.u32 %v2869_v0, 16  ;;  %v1787_v23 = vshrl.u32 %v2887_v7, 16 }
  0xd3   : > { %2522 = vmatprep.subr.msk.bf16.mxu1 %vm832_vm0, %v2650_v34  ;;  %v1711_v34 = vsel %vm832_vm0, %v2655_v56, 0 }
  0xd4   : > { %v1789_v17 = vrot.slane %v1787_v23, 4 }
  0xd6   : > { %2371 = vmatpush3.bf16.msra.mxu1 %v1067_v57  ;;  %v1829_v57 = vshrl.u32 %v2897_v10, 16 }
  0xd7   : > { %2380 = vmatprep.subr.bf16.mxu1 %v2652_v9 }
  0xd8   : > { %2421 = vmatmul.mubr.msk.bf16.vlgmr.msra.gmra.mrb[0].mxu0 %vm819_vm5, %v2180_v13  ;;  %2365 = vmatmul.mubr.msk.bf16.gmra.mrb[4].mxu1 %vm819_vm5, %v2181_v47  ;;  %v2214_v13 = vcombine.low %v3110_v61, %v3164_v5  ;;  %v2229_v61 = vcombine.low %v3284_v21, %v3288_v60  ;;  %v1790_v5 = vshll.u32 %v2887_v7, 16  ;;  %v1810_v21 = vshll.u32 %v2872_v1, 16 }
  0xd9   : > { %2429 = vmatpush3.bf16.msra.mxu0 %v2649_v52  ;;  %2424 = vmatprep.mubr.msk.bf16.mxu0 %vm819_vm5, %v2181_v47  ;;  %v1590_v52 = vshll.u32 %v3271_v58, 16  ;;  %v1264_v58 = vrot.slane %v1262_v28, 5  ;;  %v1796_v60 = vshll.u32 %v2891_v8, 16  ;;  %v1832_v7 = vshll.u32 %v2897_v10, 16 }
  0xda   : > { %2528 = vmatprep.subr.msk.bf16.mxu0 %vm832_vm0, %v2651_v29  ;;  %2372 = vmatprep.mubr.msk.bf16.mxu1 %vm819_vm5, %v2199_v12  ;;  %v1792_v6 = vrot.slane %v1790_v5, 5  ;;  %v1843_v1 = vshrl.u32 %v2929_v20, 16  ;;  %v1846_v8 = vshll.u32 %v2929_v20, 16  ;;  %v1831_v12 = vrot.slane %v1829_v57, 4 }
  0xdb   : > { %v1592_v24 = vrot.slane %v1590_v52, 5  ;;  %v1265_v41 = vsel %vm3128_vm8, %v1260_v54, %v1264_v58  ;;  %v3462_v46 = vrot.slane %v1796_v60, 5  ;;  %v1834_v53 = vrot.slane %v1832_v7, 5 }
  0xdc   : > { %v1845_v10 = vrot.slane %v1843_v1, 4  ;;  %v1848_v27 = vrot.slane %v1846_v8, 5 }
  0xdd   : > { %2431 = vmatpush3.bf16.msra.mxu0 %v1613_v35  ;;  %v1835_v11 = vor.u32 %v1834_v53, %v1831_v12 }
  0xde   : > { %2440 = vmatprep.subr.bf16.mxu0 %v2653_v59  ;;  %v1849_v28 = vor.u32 %v1848_v27, %v1845_v10 }
  0xe0   : > { %2425 = vmatmul.mubr.msk.bf16.gmra.mrb[4].mxu0 %vm819_vm5, %v2254_v33  ;;  %2373 = vmatmul.mubr.msk.bf16.vlgmr.msra.gmra.mrb[0].mxu1 %vm819_vm5, %v2200_v49  ;;  %v1824_v33 = vshll.u32 %v3611_v22, 16 }
  0xe1   : > { %2432 = vmatprep.mubr.msk.bf16.mxu0 %vm819_vm5, %v3179_v36  ;;  %2376 = vmatprep.mubr.msk.bf16.mxu1 %vm819_vm5, %v2201_v3  ;;  %v1588_v36 = vrot.slane %v1587_v30, 4 }
  0xe2   : > { %2381 = vmatpush3.bf16.msra.mxu1 %v2652_v9  ;;  %v1793_v9 = vor.u32 %v1792_v6, %v1789_v17  ;;  %v3618_v17 = vld [vmem:[#allocation13_spill] sm:$0xff] }
  0xe3   : > { %2523 = vmatprep.subr.msk.bf16.mxu1 %vm832_vm0, %v2654_v38  ;;  %v1894_v6 = vshll.u32 %v3618_v17, 16 }
  0xe4   : > { %v1794_v55 = vrot.slane %v1793_v9, 4 }
  0xe5   : > { %v1896_v57 = vrot.slane %v1894_v6, 5 }
  0xe6   : > { %2383 = vmatpush3.bf16.msra.mxu1 %v1174_v18  ;;  %v1799_v20 = vsel %vm3128_vm8, %v1794_v55, %v3462_v46 }
  0xe7   : > { %2452 = vmatprep.subr.bf16.mxu1 %v2950_v26  ;;  %v1906_v22 = vunpack.c.l.bf16 %v1799_v20 }
  0xe8   : > { %2433 = vmatmul.mubr.msk.bf16.vlgmr.msra.gmra.mrb[0].mxu0 %vm819_vm5, %v3293_v15  ;;  %2377 = vmatmul.mubr.msk.bf16.gmra.mrb[4].mxu1 %vm819_vm5, %v2202_v31  ;;  %v1593_v15 = vsel %vm3128_vm8, %v1588_v36, %v1592_v24  ;;  %v1826_v24 = vrot.slane %v1824_v33, 5 }
  0xe9   : > { %2441 = vmatpush3.bf16.msra.mxu0 %v2653_v59  ;;  %2436 = vmatprep.mubr.msk.bf16.mxu0 %vm819_vm5, %v3316_v45  ;;  %v2266_v45 = vcombine.low %v1265_v41, %v1593_v15  ;;  %v3616_v15 = vld [vmem:[#allocation12_spill] sm:$0xff] }
  0xea   : > { %2529 = vmatprep.subr.msk.bf16.mxu0 %vm832_vm0, %v2655_v56  ;;  %2384 = vmatprep.mubr.msk.bf16.mxu1 %vm819_vm5, %v3608_v42  ;;  %v3615_v56 = vld [vmem:[#allocation8_spill] sm:$0xff] }
  0xeb   : > { %v1866_v36 = vshll.u32 %v3615_v56, 16 }
  0xed   : > { %2443 = vmatpush3.bf16.msra.mxu0 %v1711_v34 }
  0xf0   : > { %2437 = vmatmul.mubr.msk.bf16.gmra.mrb[4].mxu0 %vm819_vm5, %v2266_v45  ;;  %2385 = vmatmul.mubr.msk.bf16.vlgmr.msra.gmra.mrb[0].mxu1 %vm819_vm5, %v3609_v62  ;;  %v1888_v45 = vshll.u32 %v3616_v15, 16  ;;  %v1836_v62 = vrot.slane %v1835_v11, 4 }
  0xf1   : > { %2444 = vmatprep.mubr.msk.bf16.mxu0 %vm819_vm5, %v2200_v49  ;;  %2388 = vmatprep.mubr.msk.bf16.mxu1 %vm819_vm5, %v2214_v13  ;;  %v3613_v49 = vld [vmem:[#allocation9_spill] sm:$0xff] }
  0xf2   : > { %2454 = vmatpush3.bf16.msra.mxu1 %v2950_v26  ;;  %v2230_v26 = vcombine.low %v3308_v43, %v1265_v41  ;;  %v1815_v43 = vshrl.u32 %v2878_v4, 16  ;;  %v1852_v38 = vshll.u32 %v3613_v49, 16  ;;  %v1885_v41 = vshrl.u32 %v3616_v15, 16 }
  0xf3   : > { %2525 = vmatprep.subr.msk.bf16.mxu1 %vm832_vm0, %v2987_v37  ;;  %v1804_v37 = vshll.u32 %v2869_v0, 16  ;;  %v3460_v0 = vrot.slane %v1810_v21, 5 }
  0xf4   : > { %v1817_v29 = vrot.slane %v1815_v43, 4  ;;  %v3483_v58 = vrot.slane %v1852_v38, 5  ;;  %v1887_v5 = vrot.slane %v1885_v41, 4 }
  0xf5   : > { %v1806_v14 = vrot.slane %v1804_v37, 5 }
  0xf6   : > { %2455 = vmatpush3.bf16.msra.mxu1 %v2998_v40  ;;  %v1803_v40 = vrot.slane %v1801_v19, 4 }
  0xf8   : > { %2445 = vmatmul.mubr.msk.bf16.vlgmr.msra.gmra.mrb[0].mxu0 %vm819_vm5, %v2201_v3  ;;  %2389 = vmatmul.mubr.msk.bf16.gmra.mrb[4].mxu1 %vm819_vm5, %v2215_v63  ;;  %v1807_v44 = vor.u32 %v1806_v14, %v1803_v40  ;;  %v3614_v3 = vld [vmem:[#allocation10_spill] sm:$0xff]  ;;  %v1850_v63 = vrot.slane %v1849_v28, 4 }
  0xf9   : > { %2448 = vmatprep.mubr.msk.bf16.mxu0 %vm819_vm5, %v2202_v31  ;;  %2400 = vmatprep.mubr.msk.bf16.mxu1 %vm819_vm5, %v2229_v61  ;;  %v1871_v30 = vshrl.u32 %v3614_v3, 16  ;;  %v1874_v52 = vshll.u32 %v3614_v3, 16  ;;  %v1840_v31 = vrot.slane %v1838_v48, 5  ;;  %v3487_v61 = vrot.slane %v1866_v36, 5 }
  0xfa   : > { %v3458_v39 = vrot.slane %v1807_v44, 4  ;;  %v1855_v14 = vsel %vm3128_vm8, %v1850_v63, %v3483_v58  ;;  %v1890_v44 = vrot.slane %v1888_v45, 5 }
  0xfb   : > { %v1873_v34 = vrot.slane %v1871_v30, 4  ;;  %v1876_v42 = vrot.slane %v1874_v52, 5  ;;  %v1841_v40 = vsel %vm3128_vm8, %v1836_v62, %v1840_v31 }
  0xfc   : > { %v1813_v25 = vsel %vm3128_vm8, %v3458_v39, %v3460_v0  ;;  %v1909_v49 = vunpack.c.l.bf16 %v1841_v40  ;;  %v1910_v39 = vunpack.c.l.bf16 %v1855_v14 }
  0xfd   : > { %v1877_v23 = vor.u32 %v1876_v42, %v1873_v34 }
  0xff   : > { %v1878_v46 = vrot.slane %v1877_v23, 4 }
 0x100   : > { %2449 = vmatmul.mubr.msk.bf16.gmra.mrb[4].mxu0 %vm819_vm5, %v2277_v2  ;;  %v1818_v2 = vshll.u32 %v2878_v4, 16  ;;  %v3610_v4 = vld [vmem:[#allocation7_spill] sm:$0xff] }
 0x101   : > { %v1857_v35 = vshrl.u32 %v3610_v4, 16  ;;  %v1860_v59 = vshll.u32 %v3610_v4, 16  ;;  %v2284_v4 = vld [vmem:[%s3576_s4] ss:$0 sm:$0xff] }
 0x102   : > { %v1820_v47 = vrot.slane %v1818_v2, 5  ;;  %v1891_v2 = vor.u32 %v1890_v44, %v1887_v5 }
 0x103   : > { %v1859_v50 = vrot.slane %v1857_v35, 4  ;;  %v1862_v16 = vrot.slane %v1860_v59, 5 }
 0x104   : > { %2401 = vmatmul.mubr.msk.bf16.vlgmr.msra.gmra.mrb[4].mxu1 %vm819_vm5, %v2230_v26  ;;  %v1821_v18 = vor.u32 %v1820_v47, %v1817_v29  ;;  %v3617_v26 = vld [vmem:[#allocation11_spill] sm:$0xff]  ;;  %v1892_v1 = vrot.slane %v1891_v2, 4 }
 0x105   : > { %v1863_v54 = vor.u32 %v1862_v16, %v1859_v50  ;;  %v1880_v19 = vshll.u32 %v3617_v26, 16  ;;  %v1907_v16 = vunpack.c.l.bf16 %v1813_v25 }
 0x106   : > { %v1822_v13 = vrot.slane %v1821_v18, 4  ;;  %v1897_v8 = vsel %vm3128_vm8, %v1892_v1, %v1896_v57 }
 0x107   : > { %v1864_v21 = vrot.slane %v1863_v54, 4  ;;  %v1882_v60 = vrot.slane %v1880_v19, 5  ;;  %v1913_v41 = vunpack.c.l.bf16 %v1897_v8 }
 0x108   : > { %v1827_v37 = vsel %vm3128_vm8, %v1822_v13, %v1826_v24 }
 0x109   : > { %v1869_v43 = vsel %vm3128_vm8, %v1864_v21, %v3487_v61  ;;  %v1883_v7 = vsel %vm3128_vm8, %v1878_v46, %v1882_v60  ;;  %v1908_v53 = vunpack.c.l.bf16 %v1827_v37 }
 0x10a   : > { %v1912_v51 = vunpack.c.l.bf16 %v1883_v7  ;;  %v1911_v62 = vunpack.c.l.bf16 %v1869_v43 }
 0x1c3   : > { %v2386_v9 = vpop.f32.mrb[0].mxu1 }
 0x1c4   : > { %v1210_v29 = vpop.f32.mrb[1].mxu1 }
 0x1c5   : > { %v2387_v47 = vpop.f32.mrb[2].mxu1 }
 0x1c6   : > { %v1213_v55 = vpop.f32.mrb[3].mxu1 }
 0x1cb   : > { %v2446_v12 = vpop.f32.mrb[0].mxu0 }
 0x1cc   : > { %v2456_v35 = vadd.f32 %v2446_v12, %v2386_v9  ;;  %v1747_v59 = vpop.f32.mrb[1].mxu0 }
 0x1cd   : > { %v2457_v10 = vadd.f32 %v1747_v59, %v1210_v29  ;;  %v2447_v27 = vpop.f32.mrb[2].mxu0 }
 0x1ce   : > { %v1923_v33 = vadd.f32 %v2456_v35, %v2284_v4  ;;  %v2458_v32 = vadd.f32 %v2447_v27, %v2387_v47  ;;  %v1750_v48 = vpop.f32.mrb[3].mxu0 }
 0x1cf   : > { %v1921_v38 = vadd.f32 %v2457_v10, %v2284_v4  ;;  %v2459_v50 = vadd.f32 %v1750_v48, %v1213_v55 }
 0x1d0   : > { %v1924_v3 = vadd.f32 %v2458_v32, %v2284_v4  ;;  %v1931_v30 = vadd.f32 %v1923_v33, %v1908_v53 }
 0x1d1   : > { %v1922_v52 = vadd.f32 %v2459_v50, %v2284_v4  ;;  %v1929_v18 = vadd.f32 %v1921_v38, %v1906_v22 }
 0x1d2   : > { %v1932_v11 = vadd.f32 %v1924_v3, %v1909_v49 }
 0x1d3   : > { %v2450_v28 = vpop.f32.mrb[4].mxu0  ;;  %1937 = vxpose.xlu0.b32.start [1/8] (short) (narrow) %v1929_v18, 8  ;;  %v1930_v20 = vadd.f32 %v1922_v52, %v1907_v16 }
 0x1d4   : > { %v1763_v56 = vpop.f32.mrb[5].mxu0 }
 0x1d5   : > { %v2451_v36 = vpop.f32.mrb[6].mxu0 }
 0x1d6   : > { %v1766_v24 = vpop.f32.mrb[7].mxu0 }
 0x1d7   : > { %1938 = vxpose.xlu0.b32.cont [2/8] (short) (narrow) %v1930_v20, 8  ;;  %v2402_v31 = vpop.f32.mrb[4].mxu1 }
 0x1d8   : > { %v2460_v58 = vadd.f32 %v2450_v28, %v2402_v31  ;;  %v1349_v54 = vpop.f32.mrb[5].mxu1 }
 0x1d9   : > { %v2461_v34 = vadd.f32 %v1763_v56, %v1349_v54  ;;  %v2403_v42 = vpop.f32.mrb[6].mxu1 }
 0x1da   : > { %v1927_v0 = vadd.f32 %v2460_v58, %v2284_v4  ;;  %v2462_v25 = vadd.f32 %v2451_v36, %v2403_v42  ;;  %v1352_v15 = vpop.f32.mrb[7].mxu1 }
 0x1db   : > { %1939 = vxpose.xlu0.b32.cont [3/8] (short) (narrow) %v1931_v30, 8  ;;  %v1925_v45 = vadd.f32 %v2461_v34, %v2284_v4  ;;  %v2463_v13 = vadd.f32 %v1766_v24, %v1352_v15 }
 0x1dc   : > { %v1928_v63 = vadd.f32 %v2462_v25, %v2284_v4  ;;  %v1935_v61 = vadd.f32 %v1927_v0, %v1912_v51 }
 0x1dd   : > { %v1926_v26 = vadd.f32 %v2463_v13, %v2284_v4  ;;  %v1933_v19 = vadd.f32 %v1925_v45, %v1910_v39 }
 0x1de   : > { %v1936_v37 = vadd.f32 %v1928_v63, %v1913_v41 }
 0x1df   : > { %1940 = vxpose.xlu0.b32.cont [4/8] (short) (narrow) %v1932_v11, 8  ;;  %v1934_v40 = vadd.f32 %v1926_v26, %v1911_v62 }
 0x1e3   : > { %1941 = vxpose.xlu0.b32.cont [5/8] (short) (narrow) %v1933_v19, 8 }
 0x1e7   : > { %1942 = vxpose.xlu0.b32.cont [6/8] (short) (narrow) %v1934_v40, 8 }
 0x1eb   : > { %1943 = vxpose.xlu0.b32.cont [7/8] (short) (narrow) %v1935_v61, 8 }
 0x1ef   : > { %1944 = vxpose.xlu0.b32.end [8/8] (short) (narrow) %v1936_v37, 8 }
 0x253   : > { %v1953_v14 = vpop.trf.xlu0 }
 0x254   : > { %1970 = vst.msk [vmem:[%s301_s14] sm:$0xff] %vm1969_vm10, %v1953_v14 }
 0x255   : > { %2669 = shalt.err (!%p2666_p10)
}
 0x256   : > { %s2670_s30 = scalar_lea.hbm %s3519_s27, 128  ;;  %s2674_s16 = scalar_lea.hbm %s3577_s5, 1024 }
 0x257   : > { %p2671_p11 = scmp.ne.s32.totalorder %s3519_s27, %s2670_s30  ;;  %p2675_p0 = scmp.lt.u32.totalorder %s3519_s27, %s3577_s5 }
 0x258   : > { %p2676_p1 = scmp.lt.u32.totalorder %s2674_s16, %s2670_s30  ;;  %p2678_p4 = scmp.lt.u32.totalorder %s2670_s30, %s3519_s27 }
 0x259   : > { %p2672_p12 = pnand %p2671_p11, %p2836_p3 }
 0x25a   : > { %p2677_p2 = por %p2676_p1, %p2675_p0 }
 0x25b   : > { %p2673_p13 = pneg %p2672_p12 }
 0x25c   : > { %p2679_p5 = por %p2678_p4, %p2677_p2 }
 0x25e   : > { %p2680_p6 = pnand %p2679_p5, %p2673_p13 }
 0x260   : > { %2683 = shalt.err (!%p2680_p6)
}
 0x261   : > { %2534 = dma.vmem_to_hbm [thread:$0]  (%p2836_p3), %s3521_s15, 128, %s3519_s27, %s1972_s9  }
 0x262 PF: > { %p2540_p7 = scmp.ge.s32.totalorder %s2750_s25, 2  ;;  %s1999_s8 = sand.u32 1, %s2722_s18  }
 0x263   : > { %s2000_s26 = scalar_lea.sflag [#allocation3], %s1999_s8 }
 0x264   : > { %p2537_p9 = pnand %p2540_p7, %p2845_p8 }
 0x266   : > { %2717 = dma.done.wait (!%p2537_p9), %s2000_s26, 128  }
 0x267   : > { %2719 = vsyncadd (!%p2537_p9), %s2000_s26, 4294967168  ;;  %s18_s25 = sadd.s32 1, %s2750_s25   ;;  %s3619_s18 = smov %s2726_s19 }
 0x268   : > { %p15_p10 = scmp.ge.s32.totalorder %s18_s25, 10   ;;  %s3620_s19 = smov %s2730_s20 }
 0x269   : > { %s3621_s20 = smov %s2854_s11  ;;  %s3622_s21 = smov %s2742_s23 }
 0x26a   : > { %s3623_s22 = smov %s2746_s24  ;;  %s3624_s23 = smov %s3627_s28 }
 0x26b   : > { %s3625_s24 = smov %s3631_s29  ;;  %17 = sbr.rel (!%p15_p10) target bundleno = 5 (0x5), region = 89 }
 0x272   :  { %2005 = vsyncpa [#allocation3], 1 }
 0x273   :  { %2007 = vsyncpa [#allocation3 + $0x1], 1 }

</bundles_post_ra>
